<compile_context>
chip_gen: v5e
topology: v5e:2x2
jax: 0.10.0
libtpu: 0.0.40
codegen_flags: <defaults>
</compile_context>

<pallas_src>
import functools

import jax
import jax.numpy as jnp
from jax.experimental import pallas as pl
from jax.experimental.pallas import tpu as pltpu


def _round_up(x, m):
    return (x + m - 1) // m * m


def _nll_kernel(table_ref, oh_ref, vals_ref, out_ref, acc_ref, *, eps):
    """One 128-sample tile of the fused NLL loss.

    table_ref: (2, L)   f32   row0 = mu table, row1 = sigma^2 table (node++edge)
    oh_ref:    (L, TM)  bf16  one-hot gather matrix for this tile of samples
    vals_ref:  (2, TM)  f32   row0 = targets, row1 = combined per-sample weights
    out_ref:   (1, 1)   f32   SMEM scalar output (final loss)
    acc_ref:   (1, 1)   f32   SMEM running sum across grid steps
    """
    i = pl.program_id(0)

    @pl.when(i == 0)
    def _init():
        acc_ref[0, 0] = jnp.float32(0.0)

    # Fused gather of both mu and sigma^2 for all samples of the tile:
    # (2, L) @ (L, TM) -> (2, TM).  Lane-dense (TM = 128) output.
    table = table_ref[...]
    oh = oh_ref[...].astype(jnp.float32)  # bf16 0/1 -> f32 (lossless)
    gathered = jnp.dot(table, oh, preferred_element_type=jnp.float32)

    mu = gathered[0:1, :]          # (1, TM)
    s2 = gathered[1:2, :]          # (1, TM)
    vals = vals_ref[...]
    tgt = vals[0:1, :]             # (1, TM)
    w = vals[1:2, :]               # (1, TM) combined weight (0 on padding)

    denom = eps + s2
    diff = tgt - mu
    per_elem = 0.5 * jnp.log(denom) + diff * diff / denom

    acc_ref[0, 0] += jnp.sum(per_elem * w)

    @pl.when(i == pl.num_programs(0) - 1)
    def _store():
        out_ref[0, 0] = acc_ref[0, 0]


def test_nll_loss_forward(n_mu, n_sigma2, e_mu, e_sigma2,
                          node_key, node_value, edge_key, edge_value,
                          *, eps=1.0, lamb=0.5, kind=0, use_weight=False):
    """Pallas implementation of TestNLLLoss.forward. Returns a scalar (f32)."""
    TM = 128  # samples per tile (lane width)

    n_mu_f = n_mu.reshape(-1).astype(jnp.float32)
    n_s2_f = n_sigma2.reshape(-1).astype(jnp.float32)
    e_mu_f = e_mu.reshape(-1).astype(jnp.float32)
    e_s2_f = e_sigma2.reshape(-1).astype(jnp.float32)

    Ln = n_mu_f.shape[0]
    Le = e_mu_f.shape[0]
    Mn = node_key.shape[0]
    Me = edge_key.shape[0]

    # --- combined lookup table (node entries first, then edge entries) -------
    L = Ln + Le
    L_pad = _round_up(L, 128)
    mu_all = jnp.concatenate([n_mu_f, e_mu_f])
    s2_all = jnp.concatenate([n_s2_f, e_s2_f])
    table = jnp.zeros((2, L_pad), jnp.float32)
    table = table.at[0, :L].set(mu_all).at[1, :L].set(s2_all)

    # --- combined sample indices / targets / folded weights ------------------
    keys = jnp.concatenate([node_key.astype(jnp.int32),
                            edge_key.astype(jnp.int32) + Ln])
    tgts = jnp.concatenate([node_value[:, 0], edge_value[:, 0]]).astype(jnp.float32)

    if kind == 1:
        cn, ce = 1.0, 0.0
    elif kind == 2:
        cn, ce = 0.0, 1.0
    else:
        cn, ce = float(lamb), 1.0 - float(lamb)
    w_node = jnp.full((Mn,), cn / Mn, jnp.float32)
    w_edge = jnp.full((Me,), ce / Me, jnp.float32)
    if use_weight:
        w_node = w_node * node_value[:, 1].astype(jnp.float32)
        w_edge = w_edge * edge_value[:, 1].astype(jnp.float32)
    wts = jnp.concatenate([w_node, w_edge])

    M = Mn + Me
    M_pad = _round_up(M, TM)

    # bf16 one-hot gather matrix (exact 0/1 values -> lossless, half the bytes).
    # TODO(synk): at much larger L*M, replace the dense one-hot with a
    # scalar-prefetched index gather to avoid the O(L*M) expansion.
    oh = jax.nn.one_hot(keys, L_pad, axis=0, dtype=jnp.bfloat16)     # (L_pad, M)
    oh = jnp.pad(oh, ((0, 0), (0, M_pad - M)))                       # (L_pad, M_pad)

    vals = jnp.zeros((2, M_pad), jnp.float32)
    vals = vals.at[0, :M].set(tgts).at[1, :M].set(wts)

    grid = (M_pad // TM,)
    kernel = functools.partial(_nll_kernel, eps=float(eps))

    out = pl.pallas_call(
        kernel,
        out_shape=jax.ShapeDtypeStruct((1, 1), jnp.float32),
        grid=grid,
        in_specs=[
            # lookup table: resident across all grid steps
            pl.BlockSpec((2, L_pad), lambda i: (0, 0)),
            # per-tile one-hot gather matrix
            pl.BlockSpec((L_pad, TM), lambda i: (0, i)),
            # per-tile [targets; weights]
            pl.BlockSpec((2, TM), lambda i: (0, i)),
        ],
        out_specs=pl.BlockSpec((1, 1), lambda i: (0, 0),
                               memory_space=pltpu.MemorySpace.SMEM),
        scratch_shapes=[pltpu.SMEM((1, 1), jnp.float32)],
        compiler_params=pltpu.CompilerParams(
            dimension_semantics=("arbitrary",),   # accumulation axis
            vmem_limit_bytes=32 * 1024 * 1024,
        ),
    )(table, oh, vals)

    return out[0, 0]


def test_nll_loss_reference(n_mu, n_sigma2, e_mu, e_sigma2,
                            node_key, node_value, edge_key, edge_value,
                            *, eps=1.0, lamb=0.5, kind=0, use_weight=False):
    """Pure-JAX transcription of the PyTorch forward (independent formulation)."""
    pre_n_mu = jnp.take(n_mu.reshape(-1), node_key)
    pre_n_s2 = jnp.take(n_sigma2.reshape(-1), node_key)
    pre_e_mu = jnp.take(e_mu.reshape(-1), edge_key)
    pre_e_s2 = jnp.take(e_sigma2.reshape(-1), edge_key)

    n_term = 0.5 * jnp.log(eps + pre_n_s2) + (node_value[:, 0] - pre_n_mu) ** 2 / (eps + pre_n_s2)
    e_term = 0.5 * jnp.log(eps + pre_e_s2) + (edge_value[:, 0] - pre_e_mu) ** 2 / (eps + pre_e_s2)
    if use_weight:
        node_loss = jnp.mean(n_term * node_value[:, 1])
        edge_loss = jnp.mean(e_term * edge_value[:, 1])
    else:
        node_loss = jnp.mean(n_term)
        edge_loss = jnp.mean(e_term)

    if kind == 1:
        return node_loss
    elif kind == 2:
        return edge_loss
    return node_loss * lamb + edge_loss * (1 - lamb)


if __name__ == "__main__":
    key = jax.random.PRNGKey(0)
    ks = jax.random.split(key, 10)

    NUM_NODES, NUM_EDGES = 48, 112        # sizes of n_mu/n_sigma2 and e_mu/e_sigma2
    MN, ME = 70, 150                      # node / edge batch sizes

    n_mu = jax.random.normal(ks[0], (NUM_NODES, 1), jnp.float32)
    n_sigma2 = jax.random.uniform(ks[1], (NUM_NODES, 1), jnp.float32, 0.1, 2.0)
    e_mu = jax.random.normal(ks[2], (NUM_EDGES, 1), jnp.float32)
    e_sigma2 = jax.random.uniform(ks[3], (NUM_EDGES, 1), jnp.float32, 0.1, 2.0)

    batch_node_key = jax.random.randint(ks[4], (MN,), 0, NUM_NODES)
    batch_edge_key = jax.random.randint(ks[5], (ME,), 0, NUM_EDGES)
    batch_node_value = jnp.stack(
        [jax.random.normal(ks[6], (MN,), jnp.float32),
         jax.random.uniform(ks[7], (MN,), jnp.float32, 0.0, 1.0)], axis=1)
    batch_edge_value = jnp.stack(
        [jax.random.normal(ks[8], (ME,), jnp.float32),
         jax.random.uniform(ks[9], (ME,), jnp.float32, 0.0, 1.0)], axis=1)

    configs = [
        dict(eps=1.0, lamb=0.5, kind=0, use_weight=False),   # module defaults
        dict(eps=1.0, lamb=0.5, kind=2, use_weight=True),    # other branches
    ]
    for cfg in configs:
        loss = test_nll_loss_forward(
            n_mu, n_sigma2, e_mu, e_sigma2,
            batch_node_key, batch_node_value, batch_edge_key, batch_edge_value,
            **cfg)
        loss = jax.block_until_ready(loss)
        ref = test_nll_loss_reference(
            n_mu, n_sigma2, e_mu, e_sigma2,
            batch_node_key, batch_node_value, batch_edge_key, batch_edge_value,
            **cfg)
        assert jnp.isfinite(loss)
        assert jnp.allclose(loss, ref, atol=1e-5, rtol=1e-5), (cfg, loss, ref)

    print("KERNEL_OK")
</pallas_src>

<mosaic_0001>
module attributes {stable_mosaic.version = 11 : i64} {
  func.func @_nll_kernel(%arg0: i32, %arg1: memref<2x256xf32, #tpu.memory_space<vmem>>, %arg2: memref<256x128xbf16, #tpu.memory_space<vmem>>, %arg3: memref<2x128xf32, #tpu.memory_space<vmem>>, %arg4: memref<1x1xf32, #tpu.memory_space<smem>>, %arg5: memref<1x1xf32, #tpu.memory_space<smem>>) attributes {dimension_semantics = [#tpu.dimension_semantics<arbitrary>], iteration_bounds = array<i64: 2>, scalar_prefetch = 0 : i64, scratch_operands = 1 : i64, tpu.core_type = #tpu.core_type<tc>, window_params = [{pipeline_mode = #tpu.pipeline_mode<synchronous>, transform_indices = @transform_0, window_bounds = array<i64: 2, 256>}, {transform_indices = @transform_1, window_bounds = array<i64: 256, 128>}, {transform_indices = @transform_2, window_bounds = array<i64: 2, 128>}, {transform_indices = @transform_3, window_bounds = array<i64: 1, 1>}]} {
    %c0_i32 = arith.constant 0 : i32
    %0 = arith.cmpi eq, %arg0, %c0_i32 : i32
    %1 = arith.extui %0 : i1 to i32
    %c0_i32_0 = arith.constant 0 : i32
    %2 = arith.cmpi ne, %1, %c0_i32_0 : i32
    scf.if %2 {
      %cst_14 = arith.constant 0.000000e+00 : f32
      %c0_15 = arith.constant 0 : index
      %c0_16 = arith.constant 0 : index
      %32 = memref.load %arg5[%c0_15, %c0_16] : memref<1x1xf32, #tpu.memory_space<smem>>
      memref.store %cst_14, %arg5[%c0_15, %c0_16] : memref<1x1xf32, #tpu.memory_space<smem>>
    } else {
    }
    %c0 = arith.constant 0 : index
    %c0_1 = arith.constant 0 : index
    %3 = vector.load %arg1[%c0, %c0_1] : memref<2x256xf32, #tpu.memory_space<vmem>>, vector<2x256xf32>
    %c0_2 = arith.constant 0 : index
    %c0_3 = arith.constant 0 : index
    %4 = vector.load %arg2[%c0_2, %c0_3] : memref<256x128xbf16, #tpu.memory_space<vmem>>, vector<256x128xbf16>
    %5 = arith.extf %4 : vector<256x128xbf16> to vector<256x128xf32>
    %cst = arith.constant dense<0.000000e+00> : vector<2x128xf32>
    %6 = tpu.matmul %3, %5, %cst {dimension_numbers = #tpu.dot_dimension_numbers<[1], [0], [0], [1], [0, 0, 1, 1], [], []>} : vector<2x256xf32>, vector<256x128xf32>, vector<2x128xf32> -> vector<2x128xf32>
    %7 = vector.extract_strided_slice %6 {offsets = [0, 0], sizes = [1, 128], strides = [1, 1]} : vector<2x128xf32> to vector<1x128xf32>
    %8 = vector.extract_strided_slice %6 {offsets = [1, 0], sizes = [1, 128], strides = [1, 1]} : vector<2x128xf32> to vector<1x128xf32>
    %c0_4 = arith.constant 0 : index
    %c0_5 = arith.constant 0 : index
    %9 = vector.load %arg3[%c0_4, %c0_5] : memref<2x128xf32, #tpu.memory_space<vmem>>, vector<2x128xf32>
    %10 = vector.extract_strided_slice %9 {offsets = [0, 0], sizes = [1, 128], strides = [1, 1]} : vector<2x128xf32> to vector<1x128xf32>
    %11 = vector.extract_strided_slice %9 {offsets = [1, 0], sizes = [1, 128], strides = [1, 1]} : vector<2x128xf32> to vector<1x128xf32>
    %cst_6 = arith.constant 1.000000e+00 : f32
    %12 = vector.broadcast %cst_6 : f32 to vector<1x128xf32>
    %13 = arith.addf %12, %8 : vector<1x128xf32>
    %14 = arith.subf %10, %7 : vector<1x128xf32>
    %15 = math.log %13 : vector<1x128xf32>
    %cst_7 = arith.constant 5.000000e-01 : f32
    %16 = vector.broadcast %cst_7 : f32 to vector<1x128xf32>
    %17 = arith.mulf %16, %15 : vector<1x128xf32>
    %18 = arith.mulf %14, %14 : vector<1x128xf32>
    %19 = arith.divf %18, %13 : vector<1x128xf32>
    %20 = arith.addf %17, %19 : vector<1x128xf32>
    %c0_8 = arith.constant 0 : index
    %c0_9 = arith.constant 0 : index
    %21 = memref.load %arg5[%c0_8, %c0_9] : memref<1x1xf32, #tpu.memory_space<smem>>
    %22 = arith.mulf %20, %11 : vector<1x128xf32>
    %23 = vector.shape_cast %22 : vector<1x128xf32> to vector<1x1x128xf32>
    %cst_10 = arith.constant dense<0.000000e+00> : vector<1xf32>
    %24 = vector.multi_reduction <add>, %23, %cst_10 [1, 2] : vector<1x1x128xf32> to vector<1xf32>
    %25 = vector.shape_cast %24 : vector<1xf32> to vector<1x1x1xf32>
    %26 = vector.extract %25[0, 0, 0] : f32 from vector<1x1x1xf32>
    %27 = arith.addf %21, %26 : f32
    %c0_11 = arith.constant 0 : index
    %c0_12 = arith.constant 0 : index
    %28 = memref.load %arg5[%c0_11, %c0_12] : memref<1x1xf32, #tpu.memory_space<smem>>
    memref.store %27, %arg5[%c0_11, %c0_12] : memref<1x1xf32, #tpu.memory_space<smem>>
    %c1_i32 = arith.constant 1 : i32
    %29 = arith.cmpi eq, %arg0, %c1_i32 : i32
    %30 = arith.extui %29 : i1 to i32
    %c0_i32_13 = arith.constant 0 : i32
    %31 = arith.cmpi ne, %30, %c0_i32_13 : i32
    scf.if %31 {
      %c0_14 = arith.constant 0 : index
      %c0_15 = arith.constant 0 : index
      %32 = memref.load %arg5[%c0_14, %c0_15] : memref<1x1xf32, #tpu.memory_space<smem>>
      %c0_16 = arith.constant 0 : index
      %c0_17 = arith.constant 0 : index
      %33 = memref.load %arg4[%c0_16, %c0_17] : memref<1x1xf32, #tpu.memory_space<smem>>
      memref.store %32, %arg4[%c0_16, %c0_17] : memref<1x1xf32, #tpu.memory_space<smem>>
    } else {
    }
    return
  }
  func.func @transform_0(%arg0: i32) -> (i32, i32) {
    %c0_i32 = arith.constant 0 : i32
    %c0_i32_0 = arith.constant 0 : i32
    %c0_i32_1 = arith.constant 0 : i32
    return %c0_i32, %c0_i32_0 : i32, i32
  }
  func.func @transform_1(%arg0: i32) -> (i32, i32) {
    %c0_i32 = arith.constant 0 : i32
    %c0_i32_0 = arith.constant 0 : i32
    return %c0_i32, %arg0 : i32, i32
  }
  func.func @transform_2(%arg0: i32) -> (i32, i32) {
    %c0_i32 = arith.constant 0 : i32
    %c0_i32_0 = arith.constant 0 : i32
    return %c0_i32, %arg0 : i32, i32
  }
  func.func @transform_3(%arg0: i32) -> (i32, i32) {
    %c0_i32 = arith.constant 0 : i32
    %c0_i32_0 = arith.constant 0 : i32
    %c0_i32_1 = arith.constant 0 : i32
    return %c0_i32, %c0_i32_0 : i32, i32
  }
}

</mosaic_0001>

<bundles_post_ra>
// kernel: tpu_custom_call.1
= control target key start
LH: loop header
LB: loop body
LE: loop exit
PB: predicated region body
PF: predicated region fallthrough
CT: control target
= control target key end

     0   :  { %8 = vsyncpa [#allocation4], 0  ;;  %s999_s0 = inlined_call_operand.hbm [shape: f32[2,256], index: 0, kind: input, shape index: {}]   ;;  %s1000_s1 = inlined_call_operand.hbm [shape: bf16[256,256], index: 1, kind: input, shape index: {}]   ;;  %s1001_s2 = inlined_call_operand.hbm [shape: f32[2,256], index: 2, kind: input, shape index: {}]   ;;  %s1002_s3 = inlined_call_operand.hbm [shape: f32[1,1], index: 3, kind: output, shape index: {}]  }
   0x1   :  { %9 = vsyncpa [#allocation7], 0 }
   0x2   :  { %11 = vsyncpa [#allocation7 + $0x1], 0 }
   0x3   :  { %12 = vsyncpa [#allocation5], 0  ;;  %s840_s12 = smov 0   ;;  %s842_s13 = smov 0  }
   0x4   :  { %s844_s14 = smov 0   ;;  %s846_s15 = smov 0  }
   0x5 LB: > { %s861_s16 = sadd.s32 1, %s812_s15   ;;  %s46_s17 = sadd.s32 1, %s808_s14  ;;  %s812_s15 = sphi %s846_s15, %s1009_s15   ;;  %s808_s14 = sphi %s844_s14, %s1008_s14   ;;  %s804_s13 = sphi %s842_s13, %s1007_s13   ;;  %s800_s12 = sphi %s840_s12, %s1006_s12  }
   0x6   : > { %s43_s18 = ssub.s32 %s812_s15, %s861_s16  ;;  %p53_p0 = scmp.ne.s32.totalorder %s808_s14, %s804_s13 }
   0x7   : > { %p44_p1 = scmp.eq.s32.totalorder %s43_s18, 0  ;;  %p54_p2 = scmp.eq.s32.totalorder %s812_s15, 0 }
   0x8   : > { %p618_p3 = scmp.lt.s32.totalorder %s812_s15, 2  ;;  %s142_s20 = sand.u32 1, %s812_s15  }
   0x9   : > { %s871_s19 = scalar_select %p44_p1, %s808_s14, %s46_s17  }
   0xa   : > { %p55_p4 = por %p54_p2, %p53_p0  ;;  %s144_s21 = sand.u32 1, %s808_s14  }
   0xb   : > { %s495_s22 = sshll.u32 %s144_s21, 7  ;;  %s496_s23 = sshll.u32 %s812_s15, 2 }
   0xc   : > { %s150_s26 = scalar_lea.hbm %s1000_s1, %s496_s23  ;;  %s146_s28 = scalar_lea.vmem [#allocation6], %s495_s22 }
   0xd   : > { %s151_s27 = sshll.u32 %s150_s26, 4  ;;  %s153_s29 = sshll.u32 %s146_s28, 4  ;;  %s152_s27 = int_to_ptr.hbm [resolvable:$true] %s151_s27  ;;  %s154_s29 = int_to_ptr.vmem [resolvable:$true] %s153_s29 }
   0xe   : > { %p883_p5 = pnand %p618_p3, %p55_p4  ;;  %s887_s4 = scalar_lea.sflag [#allocation7], %s142_s20 }
   0xf   : > { %s666_s5 = sshra.s32 %s152_s27, 4  ;;  %s673_s9 = scalar_lea.hbm %s1000_s1, 256  ;;  %s667_s5 = int_to_ptr.hbm [resolvable:$true] %s666_s5 }
  0x10   : > { %s668_s6 = scalar_lea.hbm %s667_s5, 128  ;;  %p670_p7 = pneg %p883_p5 }
  0x11   : > { %p669_p6 = scmp.ne.s32.totalorder %s667_s5, %s668_s6  ;;  %p674_p10 = scmp.lt.s32.totalorder %s667_s5, %s1000_s1 }
  0x12   : > { %p675_p11 = scmp.lt.s32.totalorder %s673_s9, %s668_s6 }
  0x13   : > { %p671_p8 = pnand %p670_p7, %p669_p6 }
  0x14   : > { %p676_p12 = por %p675_p11, %p674_p10 }
  0x15   : > { %p672_p9 = pneg %p671_p8 }
  0x17   : > { %p677_p13 = pnand %p676_p12, %p672_p9 }
  0x19   : > { %680 = shalt.err (!%p677_p13)
}
  0x1a   : > { %s814_s17 = smov 128   ;;  %s815_s18 = smov 64  }
  0x1b   : > { %s816_s20 = smov 4   ;;  %s904_s22 = sadd.s32 4294967295, %s812_s15  }
  0x1c   : > { %613 = dma.hbm_to_vmem [thread:$0]  (!%p883_p5), %s152_s27, 2048, %s154_s29, %s887_s4, %s814_s17, %s815_s18, %s816_s20  }
  0x1d   : > { %p59_p0 = scmp.ne.s32.totalorder %s804_s13, %s800_s12  ;;  %p60_p1 = scmp.eq.s32.totalorder %s904_s22, 0 }
  0x1e   : > { %p492_p2 = scmp.ge.s32.totalorder %s812_s15, 1  ;;  %p117_p3 = scmp.lt.s32.totalorder %s812_s15, 3 }
  0x1f   : > { %p913_p4 = por %p60_p1, %p59_p0  ;;  %s129_s27 = sshll.u32 %s999_s0, 4  ;;  %s130_s27 = int_to_ptr.hbm [resolvable:$true] %s129_s27 }
  0x20   : > { %p917_p6 = pnand %p492_p2, %p117_p3  ;;  %s817_s12 = smov [#allocation3]  }
  0x21   : > { %s131_s28 = sshll.u32 %s817_s12, 4  ;;  %s497_s29 = sshll.u32 %s144_s21, 1  ;;  %s132_s28 = int_to_ptr.vmem [resolvable:$true] %s131_s28 }
  0x22   : > { %p606_p8 = pneg %p917_p6  ;;  %s498_s5 = sshll.u32 %s812_s15, 1 }
  0x23   : > { %s167_s6 = scalar_lea.vmem [#allocation8], %s497_s29  ;;  %s171_s10 = scalar_lea.hbm %s1001_s2, %s498_s5 }
  0x24   : > { %p607_p9 = pnand %p606_p8, %p60_p1  ;;  %s175_s7 = sshll.u32 %s167_s6, 4  ;;  %s176_s7 = int_to_ptr.vmem [resolvable:$true] %s175_s7 }
  0x25   : > { %s173_s11 = sshll.u32 %s171_s10, 4  ;;  %s733_s20 = scalar_lea.hbm %s1001_s2, 4  ;;  %s174_s11 = int_to_ptr.hbm [resolvable:$true] %s173_s11 }
  0x26   : > { %609 = dma.hbm_to_vmem [thread:$0]  (!%p607_p9), %s130_s27, 64, %s132_s28, [#allocation4]  }
  0x27   : > { %s726_s17 = sshra.s32 %s174_s11, 4  ;;  %s727_s17 = int_to_ptr.hbm [resolvable:$true] %s726_s17 }
  0x28   : > { %s728_s18 = scalar_lea.hbm %s727_s17, 2  ;;  %p734_p13 = scmp.lt.s32.totalorder %s727_s17, %s1001_s2 }
  0x29   : > { %p729_p10 = scmp.ne.s32.totalorder %s727_s17, %s728_s18  ;;  %p735_p0 = scmp.lt.s32.totalorder %s733_s20, %s728_s18 }
  0x2b   : > { %p731_p11 = pnand %p729_p10, %p670_p7  ;;  %p736_p2 = por %p735_p0, %p734_p13 }
  0x2d   : > { %p732_p12 = pneg %p731_p11 }
  0x2f   : > { %p737_p3 = pnand %p736_p2, %p732_p12 }
  0x31   : > { %740 = shalt.err (!%p737_p3)
}
  0x32   : > { %616 = dma.hbm_to_vmem [thread:$0]  (!%p883_p5), %s174_s11, 32, %s176_s7, %s887_s4  }
  0x33   : > { %184 = sbr.rel (%p917_p6) target bundleno = 442 (0x1ba), region = 32 }
  0x38   : > { %787 = dma.done.wait (%p60_p1), [#allocation4], 64  }
  0x39   : > { %789 = vsyncadd (%p60_p1), [#allocation4], 4294967232  ;;  %s191_s27 = sand.u32 1, %s904_s22   ;;  %s193_s12 = sand.u32 1, %s804_s13  }
  0x3a   : > { %s501_s28 = sshll.u32 %s193_s12, 7  ;;  %s192_s30 = scalar_lea.sflag [#allocation7], %s191_s27 }
  0x3b   : > { %s956_s29 = scalar_lea.vmem [#allocation6], %s501_s28 }
  0x3c   : > { %791 = dma.done.wait (%p913_p4), %s192_s30, 2080  }
  0x3d   : > { %793 = vsyncadd (%p913_p4), %s192_s30, 4294965216  ;;  %v579_v0 = vld [vmem:[%s956_s29 + $0x38] sm:$0xff]   ;;  %v578_v2 = vld [vmem:[%s956_s29 + $0x30] sm:$0xff]   ;;  %s502_s4 = sshll.u32 %s193_s12, 1  ;;  %vm380_vm4 = vcmask 1040384   ;;  %s818_s24 = smov 0.0  }
  0x3e   : > { %v587_v1 = vld [vmem:[%s956_s29 + $0x78] sm:$0xff]   ;;  %v540_v3 = vunpack.c.h.bf16 %v579_v0  ;;  %v539_v5 = vunpack.c.l.bf16 %v579_v0  ;;  %v586_v7 = vld [vmem:[%s956_s29 + $0x70] sm:$0xff]   ;;  %v536_v8 = vunpack.c.h.bf16 %v578_v2  ;;  %v577_v10 = vld [vmem:[%s956_s29 + $0x28] sm:$0xff]   ;;  %v535_v12 = vunpack.c.l.bf16 %v578_v2  ;;  %s205_s23 = scalar_lea.vmem [#allocation8], %s502_s4  ;;  %599 = sst [smem:[#allocation2]] (%p60_p1), %s818_s24 }
  0x3f   : > { %v572_v4 = vunpack.c.h.bf16 %v587_v1  ;;  %v571_v6 = vunpack.c.l.bf16 %v587_v1  ;;  %v568_v9 = vunpack.c.h.bf16 %v586_v7  ;;  %v585_v11 = vld [vmem:[%s956_s29 + $0x68] sm:$0xff]   ;;  %v567_v13 = vunpack.c.l.bf16 %v586_v7  ;;  %v235_v14 = vld [vmem:[#allocation3] sm:$0xf]  ;;  %v576_v17 = vld [vmem:[%s956_s29 + $0x20] sm:$0xff]   ;;  %s375_s5 = sld [smem:[#allocation2]]  ;;  %s407_s8 = sshll.u32 %s1002_s3, 4  ;;  %s408_s8 = int_to_ptr.hbm [resolvable:$true] %s407_s8 }
  0x40   : > { %306 = vmatpush.msra.mxu0 %v540_v3  ;;  %301 = vst [vmem:[#allocation1] ss:$4 sm:$0xff] %v235_v14  ;;  %v532_v15 = vunpack.c.h.bf16 %v577_v10  ;;  %v564_v16 = vunpack.c.h.bf16 %v585_v11  ;;  %v584_v18 = vld [vmem:[%s956_s29 + $0x60] sm:$0xff]   ;;  %v531_v19 = vunpack.c.l.bf16 %v577_v10  ;;  %v563_v20 = vunpack.c.l.bf16 %v585_v11  ;;  %v575_v23 = vld [vmem:[%s956_s29 + $0x18] sm:$0xff]   ;;  %v574_v29 = vld [vmem:[%s956_s29 + $0x10] sm:$0xff]   ;;  %p621_p5 = scmp.eq.s32.totalorder %s904_s22, 1 }
  0x41   : > { %326 = vmatpush.msra.mxu1 %v572_v4  ;;  %v528_v21 = vunpack.c.h.bf16 %v576_v17  ;;  %v560_v22 = vunpack.c.h.bf16 %v584_v18  ;;  %v583_v24 = vld [vmem:[%s956_s29 + $0x58] sm:$0xff]   ;;  %v527_v25 = vunpack.c.l.bf16 %v576_v17  ;;  %v559_v26 = vunpack.c.l.bf16 %v584_v18  ;;  %v582_v30 = vld [vmem:[%s956_s29 + $0x50] sm:$0xff]   ;;  %v573_v35 = vld [vmem:[%s956_s29 + $0x8] sm:$0xff]   ;;  %s819_s11 = smov [#allocation9]  }
  0x42   : > { %307 = vmatpush.msra.mxu0 %v539_v5  ;;  %v524_v27 = vunpack.c.h.bf16 %v575_v23  ;;  %v556_v28 = vunpack.c.h.bf16 %v583_v24  ;;  %v523_v31 = vunpack.c.l.bf16 %v575_v23  ;;  %v555_v32 = vunpack.c.l.bf16 %v583_v24  ;;  %v581_v36 = vld [vmem:[%s956_s29 + $0x48] sm:$0xff]   ;;  %v510_v41 = vld [vmem:[%s956_s29] sm:$0xff]  }
  0x43   : > { %327 = vmatpush.msra.mxu1 %v571_v6  ;;  %v520_v33 = vunpack.c.h.bf16 %v574_v29  ;;  %v552_v34 = vunpack.c.h.bf16 %v582_v30  ;;  %v519_v37 = vunpack.c.l.bf16 %v574_v29  ;;  %v551_v38 = vunpack.c.l.bf16 %v582_v30  ;;  %v580_v42 = vld [vmem:[%s956_s29 + $0x40] sm:$0xff]  }
  0x44   : > { %308 = vmatpush.msra.mxu0 %v536_v8  ;;  %v516_v39 = vunpack.c.h.bf16 %v573_v35  ;;  %v548_v40 = vunpack.c.h.bf16 %v581_v36  ;;  %v515_v43 = vunpack.c.l.bf16 %v573_v35  ;;  %v547_v44 = vunpack.c.l.bf16 %v581_v36  ;;  %v346_v58 = vld [vmem:[%s205_s23] sm:$0x3] }
  0x45   : > { %328 = vmatpush.msra.mxu1 %v568_v9  ;;  %v512_v45 = vunpack.c.h.bf16 %v510_v41  ;;  %v544_v46 = vunpack.c.h.bf16 %v580_v42  ;;  %v511_v47 = vunpack.c.l.bf16 %v510_v41  ;;  %v543_v48 = vunpack.c.l.bf16 %v580_v42 }
  0x46   : > { %309 = vmatpush.msra.mxu0 %v535_v12 }
  0x47   : > { %329 = vmatpush.msra.mxu1 %v567_v13  ;;  %v302_v49 = vld.sshfl [vmem:[#allocation1] sm:$0xff pattern:$0x73625140]  ;;  %v303_v50 = vld.sshfl [vmem:[#allocation1 + $0x8] sm:$0xff pattern:$0x73625140] }
  0x48   : > { %310 = vmatpush.msra.mxu0 %v532_v15 }
  0x49   : > { %330 = vmatpush.msra.mxu1 %v564_v16 }
  0x4a   : > { %311 = vmatpush.msra.mxu0 %v531_v19 }
  0x4b   : > { %331 = vmatpush.msra.mxu1 %v563_v20 }
  0x4c   : > { %312 = vmatpush.msra.mxu0 %v528_v21 }
  0x4d   : > { %332 = vmatpush.msra.mxu1 %v560_v22 }
  0x4e   : > { %313 = vmatpush.msra.mxu0 %v527_v25 }
  0x4f   : > { %333 = vmatpush.msra.mxu1 %v559_v26 }
  0x50   : > { %314 = vmatpush.msra.mxu0 %v524_v27 }
  0x51   : > { %334 = vmatpush.msra.mxu1 %v556_v28 }
  0x52   : > { %315 = vmatpush.msra.mxu0 %v523_v31 }
  0x53   : > { %335 = vmatpush.msra.mxu1 %v555_v32 }
  0x54   : > { %316 = vmatpush.msra.mxu0 %v520_v33 }
  0x55   : > { %336 = vmatpush.msra.mxu1 %v552_v34 }
  0x56   : > { %317 = vmatpush.msra.mxu0 %v519_v37 }
  0x57   : > { %337 = vmatpush.msra.mxu1 %v551_v38 }
  0x58   : > { %318 = vmatpush.msra.mxu0 %v516_v39 }
  0x59   : > { %338 = vmatpush.msra.mxu1 %v548_v40 }
  0x5a   : > { %319 = vmatpush.msra.mxu0 %v515_v43 }
  0x5b   : > { %339 = vmatpush.msra.mxu1 %v547_v44 }
  0x5c   : > { %320 = vmatpush.msra.mxu0 %v512_v45 }
  0x5d   : > { %340 = vmatpush.msra.mxu1 %v544_v46 }
  0x5e   : > { %321 = vmatpush.msra.mxu0 %v511_v47 }
  0x5f   : > { %341 = vmatpush.msra.mxu1 %v543_v48  ;;  %322 = vmatmul.f32.vlgmr.msra.gmra.mxu0 %v302_v49 }
  0x60   : > { %342 = vmatmul.f32.vlgmr.msra.gmra.mxu1 %v303_v50 }
  0xdc   : > { %v323_v51 = vpop.f32.mrf.mxu0 }
  0xdd   : > { %v343_v52 = vpop.f32.mrf.mxu1 }
  0xde   : > { %v344_v53 = vadd.f32 %v343_v52, %v323_v51 }
  0xe0   : > { %v347_v54 = vadd.f32 1.0, %v344_v53  ;;  %v348_v61 = vsub.f32 %v346_v58, %v344_v53 }
  0xe2   : > { %v354_v55 = vrot.slane %v347_v54, 1  ;;  %v352_v4 = vmul.f32 %v348_v61, %v348_v61 }
  0xe4   : > { %662 = vrcp.f32 %v354_v55  ;;  %v367_v60 = vand.u32 2147483648, %v354_v55  ;;  %v365_v63 = vand.u32 2147483647, %v354_v55  ;;  %vm361_vm1 = vweird.f32 %v354_v55 }
  0xe5   : > { %664 = vlog2.f32 %v347_v54 }
  0xe6   : > { %v368_v2 = vor.u32 1.1754944e-38, %v367_v60  ;;  %vm366_vm3 = vcmp.eq.f32.partialorder %v365_v63, 8.507059e+37 }
  0xea   : > { %v663_v56 = vpop.eup %662 }
  0xeb   : > { %v357_v57 = vmul.f32 %v663_v56, %v354_v55  ;;  %vm362_vm0 = vweird.f32 %v663_v56  ;;  %v665_v0 = vpop.eup %664 }
  0xec   : > { %vm363_vm2 = vmor %vm361_vm1, %vm362_vm0  ;;  %v350_v3 = vmul.f32 0.6931472, %v665_v0 }
  0xed   : > { %v358_v59 = vsub.f32 1.0, %v357_v57 }
  0xee   : > { %v351_v9 = vmul.f32 0.5, %v350_v3 }
  0xef   : > { %v359_v62 = vmul.f32 %v663_v56, %v358_v59 }
  0xf1   : > { %v360_v1 = vadd.f32 %v663_v56, %v359_v62 }
  0xf3   : > { %v364_v5 = vsel %vm363_vm2, %v663_v56, %v360_v1 }
  0xf4   : > { %v369_v6 = vsel %vm366_vm3, %v368_v2, %v364_v5 }
  0xf5   : > { %v370_v7 = vmul.f32 %v369_v6, %v352_v4 }
  0xf7   : > { %v372_v8 = vrot.slane %v370_v7, 7 }
  0xf9   : > { %v374_v10 = vadd.f32 %v372_v8, %v351_v9 }
  0xfb   : > { %v376_v11 = vmul.f32 %v374_v10, %v346_v58 }
  0xfd   : > { %v378_v12 = vrot.slane %v376_v11, 1 }
  0xff   : > { %v381_v13 = vsel %vm380_vm4, %v378_v12, 0.0 }
 0x100   : > { %382 = vadd.xlane.f32.xlu0 %v381_v13 }
 0x173   : > { %v383_v14 = vpop.xlane.xlu0 %382 }
 0x174   : > { %v384_v15 = vrot.slane %v383_v14, 4 }
 0x176   : > { %v385_v16 = vadd.f32 %v384_v15, %v383_v14 }
 0x178   : > { %v386_v17 = vrot.slane %v385_v16, 2 }
 0x17a   : > { %v387_v18 = vadd.f32 %v386_v17, %v385_v16 }
 0x17c   : > { %v388_v19 = vrot.slane %v387_v18, 1 }
 0x17e   : > { %v389_v20 = vadd.f32 %v388_v19, %v387_v18 }
 0x180   : > { %588 = vpush %v389_v20 }
 0x1b1   : > { %s589_s9 = spop %588 }
 0x1b2   : > { %s391_s10 = sadd.f32 %s589_s9, %s375_s5 }
 0x1b4   : > { %393 = sst [smem:[#allocation2]] %s391_s10 }
 0x1b5   : > { %601 = sst [smem:[#allocation9]] (%p621_p5), %s391_s10 }
 0x1b6   : > { %603 = dma.smem_to_hbm (%p621_p5), %s819_s11, 16, %s408_s8, [#allocation5]  }
 0x1b7   : > { %795 = dma.done.wait (%p621_p5), [#allocation5], 16  }
 0x1b8   : > { %797 = vsyncadd (%p621_p5), [#allocation5], 4294967280 }
 0x1b9   : > { %416 = sfence }
 0x1ba PF: > { %p15_p7 = scmp.ge.s32.totalorder %s861_s16, 4   ;;  %s1006_s12 = smov %s804_s13 }
 0x1bb   : > { %s1007_s13 = smov %s808_s14  ;;  %s1008_s14 = smov %s871_s19 }
 0x1bc   : > { %s1009_s15 = smov %s861_s16  ;;  %17 = sbr.rel (!%p15_p7) target bundleno = 5 (0x5), region = 96 }
 0x1c1   :  { %422 = vsyncpa [#allocation4], 1 }
 0x1c2   :  { %424 = vsyncpa [#allocation4 + $0x1], 1 }
 0x1c3   :  { %425 = vsyncpa [#allocation7], 1 }
 0x1c4   :  { %427 = vsyncpa [#allocation7 + $0x1], 1 }
 0x1c5   :  { %428 = vsyncpa [#allocation5], 1 }
 0x1c6   :  { %430 = vsyncpa [#allocation5 + $0x1], 1 }

</bundles_post_ra>
